<compile_context>
chip_gen: v6e
topology: v6e:2x2x1
jax: 0.10.0
libtpu: 0.0.40
codegen_flags: <defaults>
</compile_context>

<pallas_src>
import functools

import jax
import jax.numpy as jnp
from jax.experimental import pallas as pl
from jax.experimental.pallas import tpu as pltpu

_NEG_BIG = -1e30  # exp(-1e30 - m) == 0 exactly; avoids inf - inf arithmetic


def head_kernel(x_ref, w1_ref, b1_ref, w2_ref, b2_ref, tgt_ref,
                logits_ref, nll_ref, *, num_labels):
    # --- pre_classifier: Linear(dim, dim); MXU in input dtype, f32 accumulate ---
    h = jnp.dot(x_ref[...], w1_ref[...], preferred_element_type=jnp.float32)
    h = jnp.maximum(h + b1_ref[...], 0.0)            # bias + ReLU in f32 (VPU)

    # --- Dropout: eval mode -> identity ---
    # TODO(synk): training-mode dropout (stateful PRNG mask) not implemented.

    # --- classifier: Linear(dim, num_labels_padded) ---
    logits = jnp.dot(h.astype(w2_ref.dtype), w2_ref[...],
                     preferred_element_type=jnp.float32) + b2_ref[...]
    logits_ref[...] = logits.astype(logits_ref.dtype)

    # --- CrossEntropyLoss (single_label_classification), per-row NLL ---
    tb, lp = logits.shape
    lane = jax.lax.broadcasted_iota(jnp.int32, (tb, lp), 1)
    masked = jnp.where(lane < num_labels, logits, _NEG_BIG)  # kill pad columns
    m = jnp.max(masked, axis=-1, keepdims=True)
    lse = jnp.log(jnp.sum(jnp.exp(masked - m), axis=-1, keepdims=True)) + m
    tgt = tgt_ref[...]                                        # (TB, 1) int32
    tgt_logit = jnp.sum(jnp.where(lane == tgt, masked, 0.0),
                        axis=-1, keepdims=True)
    nll_ref[...] = (lse - tgt_logit).astype(nll_ref.dtype)    # (TB, 1)


def _pick_batch_tile(batch, dim, labels_padded, itemsize,
                     budget_bytes=12 * 1024 * 1024):
    """Largest batch tile (multiple of 8) whose double-buffered per-step tiles
    plus the resident weights fit comfortably under the default scoped-VMEM
    limit (safe on v5e / v6e / v7x)."""
    b_ceil = max(8, ((batch + 7) // 8) * 8)
    weight_bytes = 2 * (dim * dim * itemsize + dim * labels_padded * itemsize
                        + dim * 4 + labels_padded * 4)
    for tb in (1024, 512, 256, 128, 64, 32, 16, 8):
        if tb > b_ceil:
            continue
        tile_bytes = 2 * (tb * dim * itemsize       # x tile
                          + tb * 4                  # targets tile
                          + tb * labels_padded * 4  # logits tile (f32)
                          + tb * 4)                 # nll tile
        if tile_bytes + weight_bytes <= budget_bytes:
            return tb
    return 8


def pre_embedded_sequence_classification(x, w1, b1, w2, b2, targets):
    """x: (B, dim); w1: (dim, dim); b1: (dim,); w2: (dim, L); b2: (L,);
    targets: (B,) integer labels in [0, L).  Returns (logits (B, L) f32,
    loss scalar f32).  x / w1 / w2 may be bf16 (native MXU path) or f32."""
    B, D = x.shape
    L = w2.shape[1]
    # TODO(synk): regression (MSE) / multi-label (BCE) branches, class weights,
    # label_smoothing and ignore_index=-100 are not implemented (module defaults).

    # Lane-dense classifier output: pad labels up to a multiple of 128.
    Lp = ((L + 127) // 128) * 128
    if Lp != L:
        w2 = jnp.pad(w2, ((0, 0), (0, Lp - L)))
        b2 = jnp.pad(b2, ((0, Lp - L),))

    itemsize = jnp.dtype(x.dtype).itemsize
    TB = _pick_batch_tile(B, D, Lp, itemsize)
    Bp = ((B + TB - 1) // TB) * TB
    if Bp != B:
        x = jnp.pad(x, ((0, Bp - B), (0, 0)))
        targets = jnp.pad(targets, ((0, Bp - B),))

    tgt2d = targets.astype(jnp.int32).reshape(Bp, 1)
    b1_2d = b1.astype(jnp.float32).reshape(1, D)
    b2_2d = b2.astype(jnp.float32).reshape(1, Lp)

    grid = (Bp // TB,)
    kernel = functools.partial(head_kernel, num_labels=L)

    cost = pl.CostEstimate(
        flops=2 * Bp * D * D + 2 * Bp * D * Lp,
        transcendentals=Bp * Lp,
        bytes_accessed=(Bp * D * itemsize + D * D * itemsize
                        + D * Lp * itemsize + D * 4 + Lp * 4
                        + Bp * 4 + Bp * Lp * 4 + Bp * 4),
    )

    logits_p, nll = pl.pallas_call(
        kernel,
        out_shape=(
            jax.ShapeDtypeStruct((Bp, Lp), jnp.float32),
            jax.ShapeDtypeStruct((Bp, 1), jnp.float32),
        ),
        grid_spec=pltpu.PrefetchScalarGridSpec(
            num_scalar_prefetch=0,
            grid=grid,
            in_specs=[
                pl.BlockSpec((TB, D), lambda i: (i, 0)),   # x, batch-tiled
                pl.BlockSpec((D, D), lambda i: (0, 0)),    # w1, replicated
                pl.BlockSpec((1, D), lambda i: (0, 0)),    # b1
                pl.BlockSpec((D, Lp), lambda i: (0, 0)),   # w2 (lane-padded)
                pl.BlockSpec((1, Lp), lambda i: (0, 0)),   # b2
                pl.BlockSpec((TB, 1), lambda i: (i, 0)),   # int targets
            ],
            out_specs=(
                pl.BlockSpec((TB, Lp), lambda i: (i, 0)),  # logits (lane-dense)
                pl.BlockSpec((TB, 1), lambda i: (i, 0)),   # per-row NLL
            ),
        ),
        compiler_params=pltpu.CompilerParams(
            dimension_semantics=("parallel",),
        ),
        cost_estimate=cost,
    )(x, w1, b1_2d, w2, b2_2d, tgt2d)

    logits = logits_p[:B, :L]
    loss = jnp.sum(nll[:B, 0]) / B   # mean reduction over the real batch
    return logits, loss


def _init_linear(key, fan_in, fan_out):
    # PyTorch nn.Linear default init: U(-1/sqrt(fan_in), 1/sqrt(fan_in)).
    kw, kb = jax.random.split(key)
    bound = 1.0 / jnp.sqrt(fan_in)
    w = jax.random.uniform(kw, (fan_in, fan_out), jnp.float32, -bound, bound)
    b = jax.random.uniform(kb, (fan_out,), jnp.float32, -bound, bound)
    return w, b


if __name__ == "__main__":
    B, DIM, NUM_LABELS = 8, 32, 8

    key = jax.random.PRNGKey(0)
    kx, kt, k1, k2 = jax.random.split(key, 4)

    x_f32 = jax.random.normal(kx, (B, DIM), jnp.float32)
    targets = jax.random.randint(kt, (B,), 0, NUM_LABELS, jnp.int32)

    w1_f32, b1 = _init_linear(k1, DIM, DIM)          # pre_classifier
    w2_f32, b2 = _init_linear(k2, DIM, NUM_LABELS)   # classifier

    # bf16 activations/weights feed the MXU natively; biases & accum stay f32.
    x = x_f32.astype(jnp.bfloat16)
    w1 = w1_f32.astype(jnp.bfloat16)
    w2 = w2_f32.astype(jnp.bfloat16)

    logits, loss = pre_embedded_sequence_classification(x, w1, b1, w2, b2, targets)
    jax.block_until_ready((logits, loss))

    # Pure-JAX reference with identical bf16 casts (math in f32).
    x32 = x.astype(jnp.float32)
    w132 = w1.astype(jnp.float32)
    w232 = w2.astype(jnp.float32)
    h_ref = jnp.maximum(x32 @ w132 + b1, 0.0)
    logits_ref = h_ref.astype(jnp.bfloat16).astype(jnp.float32) @ w232 + b2
    logp_ref = jax.nn.log_softmax(logits_ref, axis=-1)
    loss_ref = -jnp.mean(logp_ref[jnp.arange(B), targets])

    assert logits.shape == (B, NUM_LABELS)
    assert jnp.allclose(logits, logits_ref, atol=2e-2, rtol=2e-2)
    assert jnp.allclose(loss, loss_ref, atol=2e-2, rtol=2e-2)

    print("KERNEL_OK")
</pallas_src>

<mosaic_0001>
module attributes {stable_mosaic.version = 11 : i64} {
  func.func @head_kernel(%arg0: i32, %arg1: memref<8x32xbf16, #tpu.memory_space<vmem>>, %arg2: memref<32x32xbf16, #tpu.memory_space<vmem>>, %arg3: memref<1x32xf32, #tpu.memory_space<vmem>>, %arg4: memref<32x128xbf16, #tpu.memory_space<vmem>>, %arg5: memref<1x128xf32, #tpu.memory_space<vmem>>, %arg6: memref<8x1xi32, #tpu.memory_space<vmem>>, %arg7: memref<8x128xf32, #tpu.memory_space<vmem>>, %arg8: memref<8x1xf32, #tpu.memory_space<vmem>>) attributes {dimension_semantics = [#tpu.dimension_semantics<parallel>], iteration_bounds = array<i64: 1>, scalar_prefetch = 0 : i64, scratch_operands = 0 : i64, tpu.core_type = #tpu.core_type<tc>, window_params = [{transform_indices = @transform_0, window_bounds = array<i64: 8, 32>}, {pipeline_mode = #tpu.pipeline_mode<synchronous>, transform_indices = @transform_1, window_bounds = array<i64: 32, 32>}, {pipeline_mode = #tpu.pipeline_mode<synchronous>, transform_indices = @transform_2, window_bounds = array<i64: 1, 32>}, {pipeline_mode = #tpu.pipeline_mode<synchronous>, transform_indices = @transform_3, window_bounds = array<i64: 32, 128>}, {pipeline_mode = #tpu.pipeline_mode<synchronous>, transform_indices = @transform_4, window_bounds = array<i64: 1, 128>}, {transform_indices = @transform_5, window_bounds = array<i64: 8, 1>}, {transform_indices = @transform_6, window_bounds = array<i64: 8, 128>}, {transform_indices = @transform_7, window_bounds = array<i64: 8, 1>}]} {
    %c0 = arith.constant 0 : index
    %c0_0 = arith.constant 0 : index
    %0 = vector.load %arg1[%c0, %c0_0] : memref<8x32xbf16, #tpu.memory_space<vmem>>, vector<8x32xbf16>
    %c0_1 = arith.constant 0 : index
    %c0_2 = arith.constant 0 : index
    %1 = vector.load %arg2[%c0_1, %c0_2] : memref<32x32xbf16, #tpu.memory_space<vmem>>, vector<32x32xbf16>
    %cst = arith.constant dense<0.000000e+00> : vector<8x32xf32>
    %2 = tpu.matmul %0, %1, %cst {dimension_numbers = #tpu.dot_dimension_numbers<[1], [0], [0], [1], [0, 0, 1, 1], [], []>} : vector<8x32xbf16>, vector<32x32xbf16>, vector<8x32xf32> -> vector<8x32xf32>
    %c0_3 = arith.constant 0 : index
    %c0_4 = arith.constant 0 : index
    %3 = vector.load %arg3[%c0_3, %c0_4] : memref<1x32xf32, #tpu.memory_space<vmem>>, vector<1x32xf32>
    %4 = vector.broadcast %3 : vector<1x32xf32> to vector<8x32xf32>
    %5 = arith.addf %2, %4 : vector<8x32xf32>
    %cst_5 = arith.constant 0.000000e+00 : f32
    %6 = vector.broadcast %cst_5 : f32 to vector<8x32xf32>
    %7 = arith.maximumf %5, %6 : vector<8x32xf32>
    %8 = arith.truncf %7 : vector<8x32xf32> to vector<8x32xbf16>
    %c0_6 = arith.constant 0 : index
    %c0_7 = arith.constant 0 : index
    %9 = vector.load %arg4[%c0_6, %c0_7] : memref<32x128xbf16, #tpu.memory_space<vmem>>, vector<32x128xbf16>
    %cst_8 = arith.constant dense<0.000000e+00> : vector<8x128xf32>
    %10 = tpu.matmul %8, %9, %cst_8 {dimension_numbers = #tpu.dot_dimension_numbers<[1], [0], [0], [1], [0, 0, 1, 1], [], []>} : vector<8x32xbf16>, vector<32x128xbf16>, vector<8x128xf32> -> vector<8x128xf32>
    %c0_9 = arith.constant 0 : index
    %c0_10 = arith.constant 0 : index
    %11 = vector.load %arg5[%c0_9, %c0_10] : memref<1x128xf32, #tpu.memory_space<vmem>>, vector<1x128xf32>
    %12 = vector.broadcast %11 : vector<1x128xf32> to vector<8x128xf32>
    %13 = arith.addf %10, %12 : vector<8x128xf32>
    %c0_11 = arith.constant 0 : index
    %c0_12 = arith.constant 0 : index
    %14 = vector.load %arg7[%c0_11, %c0_12] : memref<8x128xf32, #tpu.memory_space<vmem>>, vector<8x128xf32>
    tpu.vector_store %arg7[%c0_11, %c0_12], %13 {strides = array<i32>} : memref<8x128xf32, #tpu.memory_space<vmem>>, vector<8x128xf32>,
    %15 = tpu.iota {dimensions = array<i32: 1>} : vector<8x128xi32>
    %c8_i32 = arith.constant 8 : i32
    %16 = vector.broadcast %c8_i32 : i32 to vector<8x128xi32>
    %17 = arith.cmpi slt, %15, %16 : vector<8x128xi32>
    %cst_13 = arith.constant -1.000000e+30 : f32
    %18 = vector.broadcast %cst_13 : f32 to vector<8x128xf32>
    %19 = arith.select %17, %13, %18 : vector<8x128xi1>, vector<8x128xf32>
    %cst_14 = arith.constant dense<0xFF800000> : vector<8xf32>
    %20 = vector.multi_reduction <maximumf>, %19, %cst_14 [1] : vector<8x128xf32> to vector<8xf32>
    %21 = vector.shape_cast %20 : vector<8xf32> to vector<8x1xf32>
    %22 = vector.broadcast %21 : vector<8x1xf32> to vector<8x128xf32>
    %23 = arith.subf %19, %22 : vector<8x128xf32>
    %24 = math.exp %23 : vector<8x128xf32>
    %cst_15 = arith.constant dense<0.000000e+00> : vector<8xf32>
    %25 = vector.multi_reduction <add>, %24, %cst_15 [1] : vector<8x128xf32> to vector<8xf32>
    %26 = vector.shape_cast %25 : vector<8xf32> to vector<8x1xf32>
    %27 = math.log %26 : vector<8x1xf32>
    %28 = arith.addf %27, %21 : vector<8x1xf32>
    %c0_16 = arith.constant 0 : index
    %c0_17 = arith.constant 0 : index
    %29 = vector.load %arg6[%c0_16, %c0_17] : memref<8x1xi32, #tpu.memory_space<vmem>>, vector<8x1xi32>
    %30 = vector.broadcast %29 : vector<8x1xi32> to vector<8x128xi32>
    %31 = arith.cmpi eq, %15, %30 : vector<8x128xi32>
    %cst_18 = arith.constant 0.000000e+00 : f32
    %32 = vector.broadcast %cst_18 : f32 to vector<8x128xf32>
    %33 = arith.select %31, %19, %32 : vector<8x128xi1>, vector<8x128xf32>
    %cst_19 = arith.constant dense<0.000000e+00> : vector<8xf32>
    %34 = vector.multi_reduction <add>, %33, %cst_19 [1] : vector<8x128xf32> to vector<8xf32>
    %35 = vector.shape_cast %34 : vector<8xf32> to vector<8x1xf32>
    %36 = arith.subf %28, %35 : vector<8x1xf32>
    %c0_20 = arith.constant 0 : index
    %c0_21 = arith.constant 0 : index
    %37 = vector.load %arg8[%c0_20, %c0_21] : memref<8x1xf32, #tpu.memory_space<vmem>>, vector<8x1xf32>
    tpu.vector_store %arg8[%c0_20, %c0_21], %36 {strides = array<i32>} : memref<8x1xf32, #tpu.memory_space<vmem>>, vector<8x1xf32>,
    return
  }
  func.func @transform_0(%arg0: i32) -> (i32, i32) {
    %c0_i32 = arith.constant 0 : i32
    %c0_i32_0 = arith.constant 0 : i32
    return %arg0, %c0_i32 : i32, i32
  }
  func.func @transform_1(%arg0: i32) -> (i32, i32) {
    %c0_i32 = arith.constant 0 : i32
    %c0_i32_0 = arith.constant 0 : i32
    %c0_i32_1 = arith.constant 0 : i32
    return %c0_i32, %c0_i32_0 : i32, i32
  }
  func.func @transform_2(%arg0: i32) -> (i32, i32) {
    %c0_i32 = arith.constant 0 : i32
    %c0_i32_0 = arith.constant 0 : i32
    %c0_i32_1 = arith.constant 0 : i32
    return %c0_i32, %c0_i32_0 : i32, i32
  }
  func.func @transform_3(%arg0: i32) -> (i32, i32) {
    %c0_i32 = arith.constant 0 : i32
    %c0_i32_0 = arith.constant 0 : i32
    %c0_i32_1 = arith.constant 0 : i32
    return %c0_i32, %c0_i32_0 : i32, i32
  }
  func.func @transform_4(%arg0: i32) -> (i32, i32) {
    %c0_i32 = arith.constant 0 : i32
    %c0_i32_0 = arith.constant 0 : i32
    %c0_i32_1 = arith.constant 0 : i32
    return %c0_i32, %c0_i32_0 : i32, i32
  }
  func.func @transform_5(%arg0: i32) -> (i32, i32) {
    %c0_i32 = arith.constant 0 : i32
    %c0_i32_0 = arith.constant 0 : i32
    return %arg0, %c0_i32 : i32, i32
  }
  func.func @transform_6(%arg0: i32) -> (i32, i32) {
    %c0_i32 = arith.constant 0 : i32
    %c0_i32_0 = arith.constant 0 : i32
    return %arg0, %c0_i32 : i32, i32
  }
  func.func @transform_7(%arg0: i32) -> (i32, i32) {
    %c0_i32 = arith.constant 0 : i32
    %c0_i32_0 = arith.constant 0 : i32
    return %arg0, %c0_i32 : i32, i32
  }
}

</mosaic_0001>

<bundles_post_ra>
// kernel: tpu_custom_call.1
= control target key start
LH: loop header
LB: loop body
LE: loop exit
PB: predicated region body
PF: predicated region fallthrough
CT: control target
= control target key end

     0   :  { %13 = vsyncpa [#allocation3], 0  ;;  %s422_s0 = inlined_call_operand.vmem [shape: bf16[8,32], index: 0, kind: input, shape index: {}]   ;;  %s423_s1 = inlined_call_operand.hbm [shape: bf16[32,32], index: 1, kind: input, shape index: {}]   ;;  %s424_s2 = inlined_call_operand.vmem [shape: f32[1,32], index: 2, kind: input, shape index: {}]   ;;  %s425_s3 = inlined_call_operand.hbm [shape: bf16[32,128], index: 3, kind: input, shape index: {}]   ;;  %s426_s4 = inlined_call_operand.vmem [shape: f32[1,128], index: 4, kind: input, shape index: {}]   ;;  %s427_s5 = inlined_call_operand.vmem [shape: s32[8,1], index: 5, kind: input, shape index: {}]   ;;  %s428_s6 = inlined_call_operand.hbm [shape: f32[8,128], index: 6, kind: output, shape index: {0}]   ;;  %s429_s7 = inlined_call_operand.vmem [shape: f32[8,1], index: 7, kind: output, shape index: {1}]  }
   0x1   :  { %14 = vsyncpa [#allocation6], 0 }
   0x2   :  { %15 = vsyncpa [#allocation4], 0  ;;  %s350_s24 = smov [#allocation2]  }
   0x3   :  { %s23_s25 = sshll.u32 %s350_s24, 4  ;;  %s24_s25 = int_to_ptr.vmem [resolvable:$true] %s23_s25 }
   0x4   :  { %s292_s26 = scalar_lea.vmem %s24_s25, 256  ;;  %p297_p1 = scmp.lt.s32.totalorder %s24_s25, %s24_s25 }
   0x5   :  { %p293_p0 = scmp.ne.s32.totalorder %s24_s25, %s292_s26  ;;  %p298_p2 = scmp.lt.s32.totalorder %s292_s26, %s292_s26 }
   0x7   :  { %p299_p3 = por %p298_p2, %p297_p1 }
   0x9   :  { %p300_p4 = pnand %p299_p3, %p293_p0 }
   0xb   :  { %303 = shalt.err (!%p300_p4)
}
   0xc   :  { %s351_s27 = smov 64   ;;  %s352_s28 = smov 4  }
   0xd   :  { %29 = dma.hbm_to_vmem [thread:$0]  %s423_s1, 256, %s24_s25, [#allocation3], %s351_s27, %s351_s27, %s352_s28  }
   0xe   :  { %s353_s8 = smov [#allocation5]  }
   0xf   :  { %s37_s9 = sshll.u32 %s353_s8, 4  ;;  %s38_s9 = int_to_ptr.vmem [resolvable:$true] %s37_s9 }
  0x10   :  { %s312_s10 = scalar_lea.vmem %s38_s9, 256  ;;  %p317_p6 = scmp.lt.s32.totalorder %s38_s9, %s38_s9 }
  0x11   :  { %p313_p5 = scmp.ne.s32.totalorder %s38_s9, %s312_s10  ;;  %p318_p7 = scmp.lt.s32.totalorder %s312_s10, %s312_s10 }
  0x13   :  { %p319_p8 = por %p318_p7, %p317_p6 }
  0x15   :  { %p320_p9 = pnand %p319_p8, %p313_p5 }
  0x17   :  { %323 = shalt.err (!%p320_p9)
}
  0x18   :  { %43 = dma.hbm_to_vmem [thread:$0]  %s425_s3, 256, %s38_s9, [#allocation6], %s351_s27, %s351_s27, %s352_s28  }
  0x19   :  { %344 = dma.done.wait [#allocation3], 256  }
  0x1a   :  { %345 = vsyncadd [#allocation3], 4294967040 }
  0x1b   :  { %346 = dma.done.wait [#allocation6], 256  }
  0x1c   :  { %347 = vsyncadd [#allocation6], 4294967040  ;;  %v354_v0 = vmov 0.0   ;;  %vm355_vm0 = vmmov 0   ;;  %v276_v1 = vld [vmem:[#allocation2 + $0x8] sm:$0xff]   ;;  %v277_v2 = vld [vmem:[#allocation2] sm:$0xff]   ;;  %v192_v15 = vlaneseq }
  0x1d   :  { %251 = vmatprep.subr.bf16.mxu0 %v354_v0  ;;  %255 = vmatprep.mubr.msk.bf16.mxu0 %vm355_vm0, %v354_v0  ;;  %v55_v3 = vld [vmem:[%s422_s0] sm:$0xf]  ;;  %vm79_vm1 = vcmask 261120   ;;  %v278_v4 = vld [vmem:[#allocation5 + $0x8] sm:$0xff]   ;;  %v279_v5 = vld [vmem:[#allocation5] sm:$0xff]   ;;  %v356_v14 = vmov 0  }
  0x1e   :  { %259 = vmatprep.subr.bf16.mxu1 %v354_v0  ;;  %263 = vmatprep.mubr.msk.bf16.mxu1 %vm355_vm0, %v354_v0  ;;  %v237_v6 = vld [vmem:[%s424_s2] ss:$0 sm:$0xff]  ;;  %v193_v16 = vand.u32 127, %v192_v15 }
  0x1f   :  { %252 = vmatpush3.bf16.msra.mxu0 %v276_v1  ;;  %260 = vmatpush3.bf16.msra.mxu1 %v278_v4  ;;  %v241_v17 = vld [vmem:[%s426_s4] ss:$0 sm:$0xff]  ;;  %s357_s4 = smov [#allocation7]  }
  0x20   :  { %253 = vmatprep.subr.bf16.mxu0 %v354_v0  ;;  %261 = vmatprep.subr.bf16.mxu1 %v354_v0  ;;  %vm194_vm2 = vcmp.lt.s32.totalorder %v193_v16, 8  ;;  %v206_v24 = vld [vmem:[%s427_s5] sm:$0xff]  ;;  %s223_s17 = sshll.u32 %s357_s4, 4  ;;  %s224_s17 = int_to_ptr.vmem [resolvable:$true] %s223_s17 }
  0x21   :  { %275 = vset.pattern.permute.xlu0 %v356_v14  ;;  %s324_s18 = scalar_lea.vmem %s224_s17, 128  ;;  %p329_p11 = scmp.lt.s32.totalorder %s224_s17, %s224_s17 }
  0x22   :  { %p325_p10 = scmp.ne.s32.totalorder %s224_s17, %s324_s18  ;;  %p330_p12 = scmp.lt.s32.totalorder %s324_s18, %s324_s18 }
  0x23   :  { %254 = vmatpush3.bf16.msra.mxu0 %v277_v2  ;;  %262 = vmatpush3.bf16.msra.mxu1 %v279_v5 }
  0x24   :  { %p331_p13 = por %p330_p12, %p329_p11 }
  0x26   :  { %256 = vmatmul.mubr.msk.bf16.vlgmr.msra.gmra.mxu0 %vm79_vm1, %v55_v3  ;;  %p332_p0 = pnand %p331_p13, %p325_p10 }
  0xe6   :  { %v117_v7 = vpop.f32.mrf.mxu0 }
  0xe7   :  { %v118_v8 = vadd.f32 %v237_v6, %v117_v7 }
  0xe8   :  { %v257_v9 = vpop.f32.mrf.mxu0 }
  0xe9   :  { %v123_v10 = vmax.f32 %v118_v8, 0.0 }
  0xea   :  { %v120_v11 = vpop.f32.mrf.mxu0 }
  0xeb   :  { %v124_v12 = vpack.c.bf16 %v123_v10, %v123_v10 }
  0xec   :  { %v258_v13 = vpop.f32.mrf.mxu0 }
  0xed   :  { %264 = vmatmul.mubr.msk.bf16.vlgmr.msra.gmra.mxu1 %vm79_vm1, %v124_v12 }
 0x1ad   :  { %v185_v18 = vpop.f32.mrf.mxu1 }
 0x1ae   :  { %v186_v19 = vadd.f32 %v241_v17, %v185_v18 }
 0x1af   :  { %v265_v20 = vpop.f32.mrf.mxu1 }
 0x1b0   :  { %191 = vst [vmem:[#allocation7] sm:$0xff] %v186_v19  ;;  %v195_v21 = vsel %vm194_vm2, %v186_v19, -1e+30 }
 0x1b1   :  { %196 = vmax.xlane.f32.xlu0 %v195_v21  ;;  %v188_v22 = vpop.f32.mrf.mxu1 }
 0x1b3   :  { %v266_v23 = vpop.f32.mrf.mxu1 }
 0x1c7   :  { %208 = vperm.xlu0 %275, %v206_v24  }
 0x23a   :  { %v197_v25 = vpop.xlane.xlu0 %196 }
 0x23b   :  { %v198_v26 = vsub.f32 %v195_v21, %v197_v25 }
 0x23d   :  { %v199_v27 = vmul.f32 1.442695, %v198_v26 }
 0x23f   :  { %280 = vpow2.f32 %v199_v27 }
 0x242   :  { %v209_v28 = vpop.permute.xlu0 %208 }
 0x243   :  { %vm210_vm3 = vcmp.eq.s32.totalorder %v193_v16, %v209_v28 }
 0x244   :  { %v211_v30 = vsel %vm210_vm3, %v195_v21, 0.0 }
 0x24c   :  { %v281_v29 = vpop.eup %280 }
 0x24d   :  { %201 = vadd.xlane.f32.xlu1 %v281_v29 }
 0x251   :  { %212 = vadd.xlane.f32.xlu1 %v211_v30 }
 0x252   :  { %335 = shalt.err (!%p332_p0)
}
 0x253   :  { %226 = dma.vmem_to_hbm [thread:$0]  %s224_s17, 128, %s428_s6, [#allocation4]   ;;  %vm215_vm4 = vcmask 7168  }
 0x2d6   :  { %v202_v31 = vpop.xlane.xlu1 %201 }
 0x2d7   :  { %282 = vlog2.f32 %v202_v31 }
 0x2da   :  { %v213_v35 = vpop.xlane.xlu1 %212 }
 0x2e4   :  { %v283_v32 = vpop.eup %282 }
 0x2e5   :  { %v204_v33 = vmul.f32 0.6931472, %v283_v32 }
 0x2e7   :  { %v205_v34 = vadd.f32 %v204_v33, %v197_v25 }
 0x2e9   :  { %v214_v36 = vsub.f32 %v205_v34, %v213_v35 }
 0x2eb   :  { %216 = vst.msk [vmem:[%s429_s7] sm:$0xff] %vm215_vm4, %v214_v36 }
 0x2ec   :  { %348 = dma.done.wait [#allocation4], 128  }
 0x2ed   :  { %349 = vsyncadd [#allocation4], 4294967168 }
 0x2ee   :  { %234 = vsyncpa [#allocation3], 1 }
 0x2ef   :  { %235 = vsyncpa [#allocation6], 1 }
 0x2f0   :  { %236 = vsyncpa [#allocation4], 1 }

</bundles_post_ra>
